<compile_context>
chip_gen: v7x
topology: tpu7x:2x2x1
jax: 0.10.0
libtpu: 0.0.40
codegen_flags: <defaults>
</compile_context>

<pallas_src>
import jax
import jax.numpy as jnp
from jax.experimental import pallas as pl
from jax.experimental.pallas import tpu as pltpu

# ----- static config -----
LATENT = 8
N_COND = 4
D_IN = LATENT + N_COND          # fused CondLayer input width (= 12)
H1, H2, D_OUT = 32, 64, 16      # layer_dims = [32, 64, 16]
EPS = 1e-5                      # torch.nn.LayerNorm default


def _layernorm_no_affine(h):
    # nn.LayerNorm(dim, elementwise_affine=False): biased variance over last dim.
    # var as E[x^2] - mu^2 so both cross-lane reductions are independent (XLU).
    mu = jnp.mean(h, axis=-1, keepdims=True)
    ms = jnp.mean(h * h, axis=-1, keepdims=True)
    var = jnp.maximum(ms - mu * mu, 0.0)
    return (h - mu) * jax.lax.rsqrt(var + EPS)


def mmd_decoder_kernel(x_ref, c_ref, win_ref, w2_ref, w3b_ref, o_ref):
    """One fused tile of the decoder.

    x_ref  : [tb, 12] f32   latent, zero-padded in the 4 condition lanes
    c_ref  : [tb, 1]  i32   integer condition id
    win_ref: [12, 32] f32   stacked [w1.T ; wc.T]  (fused CondLayer weight)
    w2_ref : [32, 64] f32
    w3b_ref: [65, 16] f32   rows 0..63 = w3.T, row 64 = output bias
    o_ref  : [tb, 48] f32   [:, :32] = y_hat, [:, 32:] = x_hat
    """
    tb = x_ref.shape[0]

    # ---- decode1: CondLayer as a single matmul ----
    # Scatter the one-hot condition into its (zeroed) lanes of the fused input.
    lane = jax.lax.broadcasted_iota(jnp.int32, (tb, D_IN), 1)
    xin = jnp.where(lane == (LATENT + c_ref[...]), 1.0, x_ref[...])
    h1 = jnp.dot(xin, win_ref[...], preferred_element_type=jnp.float32)
    y_hat = jnp.maximum(_layernorm_no_affine(h1), 0.0)      # LN (no affine) -> ReLU

    # ---- decode2: Linear (no bias) -> LayerNorm (no affine) -> ReLU ----
    h2 = jnp.dot(y_hat, w2_ref[...], preferred_element_type=jnp.float32)
    h2 = jnp.maximum(_layernorm_no_affine(h2), 0.0)

    # ---- output: Linear (+ folded bias row) -> ReLU ----
    x_hat = jnp.dot(h2, w3b_ref[:H2, :], preferred_element_type=jnp.float32)
    x_hat = jnp.maximum(x_hat + w3b_ref[H2:, :], 0.0)

    # Single lane-dense output slab: [y_hat | x_hat].
    o_ref[:, :H1] = y_hat.astype(o_ref.dtype)
    o_ref[:, H1:] = x_hat.astype(o_ref.dtype)


def _round_up(n, m):
    return -(-n // m) * m


def mmd_decoder_forward(x, c, params, *, batch_tile=1024):
    """x: [B, LATENT] float32, c: [B] int condition ids. Returns (x_hat, y_hat)."""
    B = x.shape[0]

    # --- weight packing (would be hoisted / pre-packed once in a real model) ---
    w_in = jnp.concatenate([params["w1"].T, params["wc"].T], axis=0).astype(jnp.float32)        # [12,32]
    w2t = params["w2"].T.astype(jnp.float32)                                                    # [32,64]
    w3b = jnp.concatenate([params["w3"].T, params["b3"][None, :]], axis=0).astype(jnp.float32)  # [65,16]

    # --- batch padding / tiling ---
    batch_tile = _round_up(max(batch_tile, 8), 8)
    if B > batch_tile:
        # Adaptive tile: keep the tile count a `batch_tile` split would give, but shrink
        # the tile so ragged batches pad by < 8 rows instead of up to a full tile.
        n_tiles = pl.cdiv(B, batch_tile)
        tb = _round_up(pl.cdiv(B, n_tiles), 8)
        Bp = tb * n_tiles
        grid = (n_tiles,)
    else:
        tb = Bp = _round_up(B, 8)
        grid = None

    x12 = jnp.zeros((Bp, D_IN), jnp.float32).at[:B, :LATENT].set(x.astype(jnp.float32))
    c_p = jnp.zeros((Bp, 1), jnp.int32).at[:B, 0].set(c.astype(jnp.int32))

    out_shape = jax.ShapeDtypeStruct((Bp, H1 + D_OUT), jnp.float32)

    if grid is None:
        # Single-shot: whole arrays in VMEM, no 1-iteration software pipeline.
        out = pl.pallas_call(mmd_decoder_kernel, out_shape=out_shape)(
            x12, c_p, w_in, w2t, w3b)
    else:
        # Batch-tiled: weights stay VMEM-resident (constant block index); batch axis
        # marked 'parallel' so v7x's two TensorCores split it. Tile footprint is tiny
        # (< a few MiB even at tb=1024), so no vmem_limit_bytes bump is needed.
        out = pl.pallas_call(
            mmd_decoder_kernel,
            grid=grid,
            in_specs=[
                pl.BlockSpec((tb, D_IN), lambda i: (i, 0)),
                pl.BlockSpec((tb, 1), lambda i: (i, 0)),
                pl.BlockSpec(w_in.shape, lambda i: (0, 0)),
                pl.BlockSpec(w2t.shape, lambda i: (0, 0)),
                pl.BlockSpec(w3b.shape, lambda i: (0, 0)),
            ],
            out_specs=pl.BlockSpec((tb, H1 + D_OUT), lambda i: (i, 0)),
            out_shape=out_shape,
            compiler_params=pltpu.CompilerParams(
                dimension_semantics=("parallel",)),
        )(x12, c_p, w_in, w2t, w3b)

    y_hat = out[:B, :H1]
    x_hat = out[:B, H1:]
    return x_hat, y_hat


def reference_forward(x, c, params):
    cond_oh = jax.nn.one_hot(c, N_COND, dtype=jnp.float32)
    h1 = x @ params["w1"].T + cond_oh @ params["wc"].T
    mu = h1.mean(-1, keepdims=True)
    var = ((h1 - mu) ** 2).mean(-1, keepdims=True)
    y_hat = jnp.maximum((h1 - mu) * jax.lax.rsqrt(var + EPS), 0.0)
    h2 = y_hat @ params["w2"].T
    mu = h2.mean(-1, keepdims=True)
    var = ((h2 - mu) ** 2).mean(-1, keepdims=True)
    h2 = jnp.maximum((h2 - mu) * jax.lax.rsqrt(var + EPS), 0.0)
    x_hat = jnp.maximum(h2 @ params["w3"].T + params["b3"], 0.0)
    return x_hat, y_hat


def make_params(key):
    # Deterministic synthetic init (torch Linear weight layout: [out, in]).
    ks = jax.random.split(key, 5)
    return {
        "w1": jax.random.normal(ks[0], (H1, LATENT), jnp.float32) * 0.2,
        "wc": jax.random.normal(ks[1], (H1, N_COND), jnp.float32) * 0.2,
        "w2": jax.random.normal(ks[2], (H2, H1), jnp.float32) * 0.2,
        "w3": jax.random.normal(ks[3], (D_OUT, H2), jnp.float32) * 0.2,
        "b3": jax.random.normal(ks[4], (D_OUT,), jnp.float32) * 0.1,
    }


if __name__ == "__main__":
    key = jax.random.PRNGKey(0)
    k_x, k_c, k_p, k_x2, k_c2, k_x3, k_c3 = jax.random.split(key, 7)
    params = make_params(k_p)

    # Small single-shot instance (no grid, no pipeline overhead).
    B = 8
    x = jax.random.normal(k_x, (B, LATENT), jnp.float32)
    c = jax.random.randint(k_c, (B,), 0, N_COND, jnp.int32)
    x_hat, y_hat = mmd_decoder_forward(x, c, params)
    jax.block_until_ready((x_hat, y_hat))
    x_ref, y_ref = reference_forward(x, c, params)
    assert x_hat.shape == (B, D_OUT) and y_hat.shape == (B, H1)
    assert jnp.allclose(x_hat, x_ref, atol=1e-4, rtol=1e-4)
    assert jnp.allclose(y_hat, y_ref, atol=1e-4, rtol=1e-4)

    # Batch-tiled 'parallel' path (weights VMEM-resident across batch tiles).
    B2 = 64
    x2 = jax.random.normal(k_x2, (B2, LATENT), jnp.float32)
    c2 = jax.random.randint(k_c2, (B2,), 0, N_COND, jnp.int32)
    x_hat2, y_hat2 = mmd_decoder_forward(x2, c2, params, batch_tile=16)
    jax.block_until_ready((x_hat2, y_hat2))
    x_ref2, y_ref2 = reference_forward(x2, c2, params)
    assert jnp.allclose(x_hat2, x_ref2, atol=1e-4, rtol=1e-4)
    assert jnp.allclose(y_hat2, y_ref2, atol=1e-4, rtol=1e-4)

    # Ragged batch on the tiled path (exercises adaptive tile + row padding).
    B3 = 37
    x3 = jax.random.normal(k_x3, (B3, LATENT), jnp.float32)
    c3 = jax.random.randint(k_c3, (B3,), 0, N_COND, jnp.int32)
    x_hat3, y_hat3 = mmd_decoder_forward(x3, c3, params, batch_tile=16)
    jax.block_until_ready((x_hat3, y_hat3))
    x_ref3, y_ref3 = reference_forward(x3, c3, params)
    assert x_hat3.shape == (B3, D_OUT) and y_hat3.shape == (B3, H1)
    assert jnp.allclose(x_hat3, x_ref3, atol=1e-4, rtol=1e-4)
    assert jnp.allclose(y_hat3, y_ref3, atol=1e-4, rtol=1e-4)

    print("KERNEL_OK")
</pallas_src>

<mosaic_0001>
module attributes {stable_mosaic.version = 11 : i64} {
  func.func @mmd_decoder_kernel(%arg0: memref<8x12xf32, #tpu.memory_space<vmem>>, %arg1: memref<8x1xi32, #tpu.memory_space<vmem>>, %arg2: memref<12x32xf32, #tpu.memory_space<vmem>>, %arg3: memref<32x64xf32, #tpu.memory_space<vmem>>, %arg4: memref<65x16xf32, #tpu.memory_space<vmem>>, %arg5: memref<8x48xf32, #tpu.memory_space<vmem>>) attributes {dimension_semantics = [], scalar_prefetch = 0 : i64, scratch_operands = 0 : i64, tpu.core_type = #tpu.core_type<tc>} {
    %0 = tpu.iota {dimensions = array<i32: 1>} : vector<8x12xi32>
    %c0 = arith.constant 0 : index
    %c0_0 = arith.constant 0 : index
    %1 = vector.load %arg1[%c0, %c0_0] : memref<8x1xi32, #tpu.memory_space<vmem>>, vector<8x1xi32>
    %c8_i32 = arith.constant 8 : i32
    %2 = vector.broadcast %c8_i32 : i32 to vector<8x1xi32>
    %3 = arith.addi %2, %1 : vector<8x1xi32>
    %4 = vector.broadcast %3 : vector<8x1xi32> to vector<8x12xi32>
    %5 = arith.cmpi eq, %0, %4 : vector<8x12xi32>
    %c0_1 = arith.constant 0 : index
    %c0_2 = arith.constant 0 : index
    %6 = vector.load %arg0[%c0_1, %c0_2] : memref<8x12xf32, #tpu.memory_space<vmem>>, vector<8x12xf32>
    %cst = arith.constant 1.000000e+00 : f32
    %7 = vector.broadcast %cst : f32 to vector<8x12xf32>
    %8 = arith.select %5, %7, %6 : vector<8x12xi1>, vector<8x12xf32>
    %c0_3 = arith.constant 0 : index
    %c0_4 = arith.constant 0 : index
    %9 = vector.load %arg2[%c0_3, %c0_4] : memref<12x32xf32, #tpu.memory_space<vmem>>, vector<12x32xf32>
    %cst_5 = arith.constant dense<0.000000e+00> : vector<8x32xf32>
    %10 = tpu.matmul %8, %9, %cst_5 {dimension_numbers = #tpu.dot_dimension_numbers<[1], [0], [0], [1], [0, 0, 1, 1], [], []>} : vector<8x12xf32>, vector<12x32xf32>, vector<8x32xf32> -> vector<8x32xf32>
    %cst_6 = arith.constant dense<0.000000e+00> : vector<8xf32>
    %11 = vector.multi_reduction <add>, %10, %cst_6 [1] : vector<8x32xf32> to vector<8xf32>
    %12 = vector.shape_cast %11 : vector<8xf32> to vector<8x1xf32>
    %cst_7 = arith.constant 3.200000e+01 : f32
    %13 = vector.broadcast %cst_7 : f32 to vector<8x1xf32>
    %14 = arith.divf %12, %13 : vector<8x1xf32>
    %15 = arith.mulf %10, %10 : vector<8x32xf32>
    %cst_8 = arith.constant dense<0.000000e+00> : vector<8xf32>
    %16 = vector.multi_reduction <add>, %15, %cst_8 [1] : vector<8x32xf32> to vector<8xf32>
    %17 = vector.shape_cast %16 : vector<8xf32> to vector<8x1xf32>
    %cst_9 = arith.constant 3.200000e+01 : f32
    %18 = vector.broadcast %cst_9 : f32 to vector<8x1xf32>
    %19 = arith.divf %17, %18 : vector<8x1xf32>
    %20 = arith.mulf %14, %14 : vector<8x1xf32>
    %21 = arith.subf %19, %20 : vector<8x1xf32>
    %cst_10 = arith.constant 0.000000e+00 : f32
    %22 = vector.broadcast %cst_10 : f32 to vector<8x1xf32>
    %23 = arith.maximumf %21, %22 : vector<8x1xf32>
    %24 = vector.broadcast %14 : vector<8x1xf32> to vector<8x32xf32>
    %25 = arith.subf %10, %24 : vector<8x32xf32>
    %cst_11 = arith.constant 9.99999974E-6 : f32
    %26 = vector.broadcast %cst_11 : f32 to vector<8x1xf32>
    %27 = arith.addf %23, %26 : vector<8x1xf32>
    %28 = math.rsqrt %27 : vector<8x1xf32>
    %29 = vector.broadcast %28 : vector<8x1xf32> to vector<8x32xf32>
    %30 = arith.mulf %25, %29 : vector<8x32xf32>
    %cst_12 = arith.constant 0.000000e+00 : f32
    %31 = vector.broadcast %cst_12 : f32 to vector<8x32xf32>
    %32 = arith.maximumf %30, %31 : vector<8x32xf32>
    %c0_13 = arith.constant 0 : index
    %c0_14 = arith.constant 0 : index
    %33 = vector.load %arg3[%c0_13, %c0_14] : memref<32x64xf32, #tpu.memory_space<vmem>>, vector<32x64xf32>
    %cst_15 = arith.constant dense<0.000000e+00> : vector<8x64xf32>
    %34 = tpu.matmul %32, %33, %cst_15 {dimension_numbers = #tpu.dot_dimension_numbers<[1], [0], [0], [1], [0, 0, 1, 1], [], []>} : vector<8x32xf32>, vector<32x64xf32>, vector<8x64xf32> -> vector<8x64xf32>
    %cst_16 = arith.constant dense<0.000000e+00> : vector<8xf32>
    %35 = vector.multi_reduction <add>, %34, %cst_16 [1] : vector<8x64xf32> to vector<8xf32>
    %36 = vector.shape_cast %35 : vector<8xf32> to vector<8x1xf32>
    %cst_17 = arith.constant 6.400000e+01 : f32
    %37 = vector.broadcast %cst_17 : f32 to vector<8x1xf32>
    %38 = arith.divf %36, %37 : vector<8x1xf32>
    %39 = arith.mulf %34, %34 : vector<8x64xf32>
    %cst_18 = arith.constant dense<0.000000e+00> : vector<8xf32>
    %40 = vector.multi_reduction <add>, %39, %cst_18 [1] : vector<8x64xf32> to vector<8xf32>
    %41 = vector.shape_cast %40 : vector<8xf32> to vector<8x1xf32>
    %cst_19 = arith.constant 6.400000e+01 : f32
    %42 = vector.broadcast %cst_19 : f32 to vector<8x1xf32>
    %43 = arith.divf %41, %42 : vector<8x1xf32>
    %44 = arith.mulf %38, %38 : vector<8x1xf32>
    %45 = arith.subf %43, %44 : vector<8x1xf32>
    %cst_20 = arith.constant 0.000000e+00 : f32
    %46 = vector.broadcast %cst_20 : f32 to vector<8x1xf32>
    %47 = arith.maximumf %45, %46 : vector<8x1xf32>
    %48 = vector.broadcast %38 : vector<8x1xf32> to vector<8x64xf32>
    %49 = arith.subf %34, %48 : vector<8x64xf32>
    %cst_21 = arith.constant 9.99999974E-6 : f32
    %50 = vector.broadcast %cst_21 : f32 to vector<8x1xf32>
    %51 = arith.addf %47, %50 : vector<8x1xf32>
    %52 = math.rsqrt %51 : vector<8x1xf32>
    %53 = vector.broadcast %52 : vector<8x1xf32> to vector<8x64xf32>
    %54 = arith.mulf %49, %53 : vector<8x64xf32>
    %cst_22 = arith.constant 0.000000e+00 : f32
    %55 = vector.broadcast %cst_22 : f32 to vector<8x64xf32>
    %56 = arith.maximumf %54, %55 : vector<8x64xf32>
    %c0_23 = arith.constant 0 : index
    %c0_24 = arith.constant 0 : index
    %57 = vector.load %arg4[%c0_23, %c0_24] : memref<65x16xf32, #tpu.memory_space<vmem>>, vector<64x16xf32>
    %cst_25 = arith.constant dense<0.000000e+00> : vector<8x16xf32>
    %58 = tpu.matmul %56, %57, %cst_25 {dimension_numbers = #tpu.dot_dimension_numbers<[1], [0], [0], [1], [0, 0, 1, 1], [], []>} : vector<8x64xf32>, vector<64x16xf32>, vector<8x16xf32> -> vector<8x16xf32>
    %c64 = arith.constant 64 : index
    %c0_26 = arith.constant 0 : index
    %59 = vector.load %arg4[%c64, %c0_26] : memref<65x16xf32, #tpu.memory_space<vmem>>, vector<1x16xf32>
    %60 = vector.broadcast %59 : vector<1x16xf32> to vector<8x16xf32>
    %61 = arith.addf %58, %60 : vector<8x16xf32>
    %cst_27 = arith.constant 0.000000e+00 : f32
    %62 = vector.broadcast %cst_27 : f32 to vector<8x16xf32>
    %63 = arith.maximumf %61, %62 : vector<8x16xf32>
    %c0_28 = arith.constant 0 : index
    %c0_29 = arith.constant 0 : index
    %64 = vector.load %arg5[%c0_28, %c0_29] : memref<8x48xf32, #tpu.memory_space<vmem>>, vector<8x32xf32>
    tpu.vector_store %arg5[%c0_28, %c0_29], %32 {strides = array<i32>} : memref<8x48xf32, #tpu.memory_space<vmem>>, vector<8x32xf32>,
    %c0_30 = arith.constant 0 : index
    %c32 = arith.constant 32 : index
    %65 = vector.load %arg5[%c0_30, %c32] : memref<8x48xf32, #tpu.memory_space<vmem>>, vector<8x16xf32>
    tpu.vector_store %arg5[%c0_30, %c32], %63 {strides = array<i32>} : memref<8x48xf32, #tpu.memory_space<vmem>>, vector<8x16xf32>,
    return
  }
}

</mosaic_0001>

<bundles_post_ra>
// kernel: tpu_custom_call.1
= control target key start
LH: loop header
LB: loop body
LE: loop exit
PB: predicated region body
PF: predicated region fallthrough
CT: control target
= control target key end

     0   :  { %v451_v3 = vmov 0   ;;  %v452_v5 = vmov 0.0|0.0   ;;  %vm37_vm0 = vcmask 1043456   ;;  %s565_s0 = inlined_call_operand.vmem [shape: f32[8,12], index: 0, kind: input, shape index: {}]   ;;  %s566_s1 = inlined_call_operand.vmem [shape: s32[8,1], index: 1, kind: input, shape index: {}]   ;;  %s567_s2 = inlined_call_operand.vmem [shape: f32[12,32], index: 2, kind: input, shape index: {}]   ;;  %s568_s3 = inlined_call_operand.vmem [shape: f32[32,64], index: 3, kind: input, shape index: {}]   ;;  %s569_s4 = inlined_call_operand.vmem [shape: f32[65,16], index: 4, kind: input, shape index: {}]   ;;  %s570_s5 = inlined_call_operand.hbm [shape: f32[8,48], index: 5, kind: output, shape index: {}]  }
   0x1   :  { %v23_v0 = vld [vmem:[%s566_s1] sm:$0xff]  ;;  %v32_v2 = vld [vmem:[%s567_s2 + $0x8] sm:$0xf]  ;;  %422 = vset.pattern.permute.xlu0 %v451_v3  ;;  %393 = vmatprep.subr.bf16.mxu1 %v452_v5 }
   0x2   :  { %v31_v1 = vld [vmem:[%s567_s2] sm:$0xff]  ;;  %v24_v4 = vadd.s32 8, %v23_v0 }
   0x3   :  { %v394_v6 = vpack.c.bf16 %v32_v2, %v31_v1 }
   0x4   :  { %10 = vsyncpa [#allocation3], 0  ;;  %vm453_vm1 = vmmov 1   ;;  %403 = vmatprep.subr.bf16.mxu0 %v452_v5  ;;  %26 = vperm.xlu0 %422, %v24_v4   ;;  %vm454_vm3 = vmmov 0   ;;  %v455_v7 = vmov 0.0   ;;  %v21_v8 = vlaneseq  ;;  %v29_v10 = vld [vmem:[%s565_s0] sm:$0xff] }
   0x5   :  { %vm395_vm2 = vmpackc.low %vm37_vm0, %vm453_vm1  ;;  %360 = vmatprep.mubr.msk.f32.mxu1 %vm454_vm3, %v455_v7  ;;  %390 = vmatprep.mubr.msk.f32.mxu0 %vm454_vm3, %v455_v7  ;;  %vm33_vm4 = vcmask 97280   ;;  %vm111_vm6 = vcmask 261120   ;;  %v130_v18 = vld [vmem:[%s568_s3] sm:$0xff]  ;;  %v131_v19 = vld [vmem:[%s568_s3 + $0x8] sm:$0xff]  ;;  %vm207_vm7 = vcmask 523264   ;;  %s456_s23 = smov 32  }
   0x6   :  { %396 = vmatpush3.bf16.msk.msra.mxu1 %vm395_vm2, %v394_v6  ;;  %v22_v9 = vand.u32 127, %v21_v8  ;;  %v132_v20 = vld [vmem:[%s568_s3 + $0x10] sm:$0xff]  ;;  %v398_v21 = vpack.c.bf16 %v131_v19, %v130_v18  ;;  %v133_v22 = vld [vmem:[%s568_s3 + $0x18] sm:$0xff]  ;;  %v226_v41 = vld [vmem:[%s569_s4] sm:$0xff]  ;;  %s457_s1 = smov [#allocation2]   ;;  %vm318_vm8 = vcmask 392448  }
   0x7   :  { %397 = vmatprep.subr.bf16.mxu1 %v452_v5  ;;  %v401_v23 = vpack.c.bf16 %v133_v22, %v132_v20  ;;  %v227_v42 = vld [vmem:[%s569_s4 + $0x8] sm:$0xff]  ;;  %v228_v44 = vld [vmem:[%s569_s4 + $0x10] sm:$0xff]  ;;  %v229_v45 = vld [vmem:[%s569_s4 + $0x18] sm:$0xff]  ;;  %s326_s2 = sshll.u32 %s457_s1, 4  ;;  %s327_s2 = int_to_ptr.vmem [resolvable:$true] %s326_s2 }
   0x8   :  { %v404_v43 = vpack.c.bf16 %v227_v42, %v226_v41  ;;  %v407_v46 = vpack.c.bf16 %v229_v45, %v228_v44  ;;  %v230_v47 = vld [vmem:[%s569_s4 + $0x20] sm:$0xff]  ;;  %v231_v48 = vld [vmem:[%s569_s4 + $0x28] sm:$0xff]  ;;  %v232_v50 = vld [vmem:[%s569_s4 + $0x30] sm:$0xff]  ;;  %s427_s24 = scalar_lea.vmem %s327_s2, 128  ;;  %p432_p1 = scmp.lt.s32.totalorder %s327_s2, %s327_s2 }
   0x9   :  { %v410_v49 = vpack.c.bf16 %v231_v48, %v230_v47  ;;  %v233_v51 = vld [vmem:[%s569_s4 + $0x38] sm:$0xff]  ;;  %v337_v1 = vld [vmem:[%s569_s4 + $0x40] ss:$0 sm:$0xff]  ;;  %p428_p0 = scmp.ne.s32.totalorder %s327_s2, %s427_s24  ;;  %p433_p2 = scmp.lt.s32.totalorder %s427_s24, %s427_s24 }
   0xa   :  { %405 = vmatpush3.bf16.msra.mxu0 %v404_v43  ;;  %v413_v52 = vpack.c.bf16 %v233_v51, %v232_v50 }
   0xb   :  { %406 = vmatprep.subr.bf16.mxu0 %v452_v5  ;;  %p434_p3 = por %p433_p2, %p432_p1 }
   0xd   :  { %p435_p4 = pnand %p434_p3, %p428_p0 }
   0xe   :  { %408 = vmatpush3.bf16.msra.mxu0 %v407_v46 }
   0xf   :  { %409 = vmatprep.subr.bf16.mxu0 %v452_v5 }
  0x12   :  { %411 = vmatpush3.bf16.msra.mxu0 %v410_v49 }
  0x13   :  { %412 = vmatprep.subr.bf16.mxu0 %v452_v5 }
  0x16   :  { %414 = vmatpush3.bf16.msra.mxu0 %v413_v52 }
  0x83   :  { %v27_v11 = vpop.permute.xlu0 %26 }
  0x84   :  { %vm28_vm5 = vcmp.eq.s32.totalorder %v22_v9, %v27_v11 }
  0x85   :  { %v30_v12 = vsel %vm28_vm5, 1.0, %v29_v10 }
  0x86   :  { %361 = vmatmul.mubr.msk.f32.vlgmr.msra.gmra.mrb[0].mxu1 %vm33_vm4, %v30_v12 }
  0x87   :  { %371 = vmatprep.mubr.msk.f32.mxu1 %vm454_vm3, %v455_v7  ;;  %399 = vmatpush3.bf16.msra.mxu1 %v398_v21 }
  0x88   :  { %400 = vmatprep.subr.bf16.mxu1 %v452_v5 }
  0x8b   :  { %402 = vmatpush3.bf16.msra.mxu1 %v401_v23 }
 0x159   :  { %v107_v13 = vpop.f32.mrb[0].mxu1 }
 0x15a   :  { %v362_v14 = vpop.f32.mrb[1].mxu1  ;;  %v112_v15 = vsel %vm111_vm6, %v107_v13, 0.0  ;;  %v117_v16 = vmul.f32 %v107_v13, %v107_v13 }
 0x15b   :  { %113 = vadd.xlane.f32.xlu0 %v112_v15 }
 0x15c   :  { %v118_v17 = vsel %vm111_vm6, %v117_v16, 0.0 }
 0x15d   :  { %119 = vadd.xlane.f32.xlu1 %v118_v17 }
 0x1e8   :  { %v114_v24 = vpop.xlane.xlu0 %113 }
 0x1e9   :  { %v116_v25 = vmul.f32 0.03125, %v114_v24 }
 0x1ea   :  { %v120_v26 = vpop.xlane.xlu1 %119 }
 0x1eb   :  { %v122_v27 = vmul.f32 %v116_v25, %v116_v25  ;;  %v121_v28 = vmul.f32 0.03125, %v120_v26  ;;  %v125_v32 = vsub.f32 %v107_v13, %v116_v25 }
 0x1ed   :  { %v123_v29 = vsub.f32 %v121_v28, %v122_v27 }
 0x1ef   :  { %v124_v30 = vmax.f32 %v123_v29, 0.0 }
 0x1f1   :  { %v126_v31 = vadd.f32 1e-05, %v124_v30 }
 0x1f3   :  { %423 = vrsqrt.f32 %v126_v31 }
 0x1fd   :  { %v424_v33 = vpop.eup %423 }
 0x1fe   :  { %v128_v34 = vmul.f32 %v424_v33, %v125_v32 }
 0x200   :  { %v129_v35 = vmax.f32 %v128_v34, 0.0 }
 0x202   :  { %372 = vmatmul.mubr.msk.f32.vlgmr.msra.gmra.mrb[2].mxu1 %vm111_vm6, %v129_v35  ;;  %313 = vst.msk [vmem:[#allocation2] sm:$0xff] %vm111_vm6, %v129_v35 }
 0x2d5   :  { %v203_v36 = vpop.f32.mrb[2].mxu1 }
 0x2d6   :  { %v373_v37 = vpop.f32.mrb[3].mxu1  ;;  %v208_v38 = vsel %vm207_vm7, %v203_v36, 0.0  ;;  %v213_v39 = vmul.f32 %v203_v36, %v203_v36 }
 0x2d7   :  { %209 = vadd.xlane.f32.xlu1 %v208_v38 }
 0x2d8   :  { %v214_v40 = vsel %vm207_vm7, %v213_v39, 0.0 }
 0x2db   :  { %215 = vadd.xlane.f32.xlu1 %v214_v40 }
 0x364   :  { %v210_v53 = vpop.xlane.xlu1 %209 }
 0x365   :  { %v212_v54 = vmul.f32 0.015625, %v210_v53 }
 0x367   :  { %v218_v56 = vmul.f32 %v212_v54, %v212_v54  ;;  %v221_v61 = vsub.f32 %v203_v36, %v212_v54 }
 0x368   :  { %v216_v55 = vpop.xlane.xlu1 %215 }
 0x369   :  { %v217_v57 = vmul.f32 0.015625, %v216_v55 }
 0x36b   :  { %v219_v58 = vsub.f32 %v217_v57, %v218_v56 }
 0x36d   :  { %v220_v59 = vmax.f32 %v219_v58, 0.0 }
 0x36f   :  { %v222_v60 = vadd.f32 1e-05, %v220_v59 }
 0x371   :  { %425 = vrsqrt.f32 %v222_v60 }
 0x37b   :  { %v426_v62 = vpop.eup %425 }
 0x37c   :  { %v224_v63 = vmul.f32 %v426_v62, %v221_v61 }
 0x37e   :  { %v225_v0 = vmax.f32 %v224_v63, 0.0 }
 0x380   :  { %391 = vmatmul.mubr.msk.f32.vlgmr.msra.gmra.mrb[0].mxu0 %vm207_vm7, %v225_v0 }
 0x453   :  { %v308_v2 = vpop.f32.mrb[0].mxu0 }
 0x454   :  { %v309_v3 = vadd.f32 %v337_v1, %v308_v2  ;;  %v392_v4 = vpop.f32.mrb[1].mxu0 }
 0x456   :  { %v312_v5 = vmax.f32 %v309_v3, 0.0 }
 0x458   :  { %315 = vrot.lane.b32.xlu1 %v312_v5, %s456_s23 }
 0x4ca   :  { %v316_v6 = vpop.permute.xlu1 %315 }
 0x4cb   :  { %319 = vst.msk [vmem:[#allocation2] sm:$0xff] %vm318_vm8, %v316_v6 }
 0x4cc   :  { %438 = shalt.err (!%p435_p4)
}
 0x4cd   :  { %s439_s0 = scalar_lea.hbm %s570_s5, 128 }
 0x4ce   :  { %p440_p5 = scmp.ne.s32.totalorder %s570_s5, %s439_s0  ;;  %p443_p6 = scmp.lt.u32.totalorder %s439_s0, %s570_s5 }
 0x4d0   :  { %p445_p7 = pnand %p443_p6, %p440_p5 }
 0x4d2   :  { %448 = shalt.err (!%p445_p7)
}
 0x4d3   :  { %329 = dma.vmem_to_hbm [thread:$0]  %s327_s2, 128, %s570_s5, [#allocation3]  }
 0x4d4   :  { %449 = dma.done.wait [#allocation3], 128  }
 0x4d5   :  { %450 = vsyncadd [#allocation3], 4294967168 }
 0x4d6   :  { %333 = vsyncpa [#allocation3], 1 }

</bundles_post_ra>
